<compile_context>
chip_gen: v6e
topology: v6e:2x2x1
jax: 0.10.0
libtpu: 0.0.40
codegen_flags: <defaults>
</compile_context>

<pallas_src>
import functools

import jax
import jax.numpy as jnp
from jax.experimental import pallas as pl
from jax.experimental.pallas import tpu as pltpu


def _round_up(v, m):
    return ((v + m - 1) // m) * m


def _layernorm_kernel(x_ref, g_ref, b_ref, o_ref, *, eps, h_true, n_pad):
    # x_ref: (tm, H_pad) tile; g_ref / b_ref: (1, H_pad) float32, grid-resident.
    x = x_ref[...].astype(jnp.float32)
    inv_h = 1.0 / float(h_true)
    u = jnp.sum(x, axis=-1, keepdims=True) * inv_h          # mean over true columns
    xc = x - u                                              # x dead after this point
    ss = jnp.sum(xc * xc, axis=-1, keepdims=True)
    if n_pad:
        # Padded columns are zeros, so they contribute n_pad * u^2 to sum((x-u)^2);
        # subtract exactly (static n_pad) to recover the true centered sum of squares.
        ss = ss - (u * u) * float(n_pad)
    s = ss * inv_h                                          # biased variance (2-pass, stable)
    inv = jax.lax.rsqrt(s + eps)                            # epsilon inside sqrt, EUP rsqrt
    # Fused affine: g * (xc * inv) + b == xc * (inv * g) + b
    o_ref[...] = (xc * (inv * g_ref[...]) + b_ref[...]).astype(o_ref.dtype)


def _pick_tile_rows(rows, H, itemsize, vmem_bytes):
    """Row-tile size: byte-targeted, VMEM-capped, grid-depth-capped, pack-aligned."""
    # Sublane packing: 8 rows for 32-bit, 16 for 16-bit, 32 for 8-bit dtypes.
    pack = max((4 // max(itemsize, 1)) * 8, 8)

    # Per-row VMEM footprint: double-buffered in + out tiles in x dtype
    # (2 bufs * 2 arrays) plus ~2 live f32 full-width intermediates in-kernel.
    per_row = H * (4 * itemsize + 8)

    # (a) Byte-based target: ~4 MiB of x per block -> near HBM-roofline pipelining
    #     independent of H (0.35 us/step overhead amortized).
    target_tile_bytes = 4 << 20
    tm = max(target_tile_bytes // max(H * max(itemsize, 4), 1), pack)

    # (b) VMEM ceiling: 50% of per-core capacity (headroom for g/b, compiler scratch).
    tm = min(tm, max((vmem_bytes // 2) // max(per_row, 1), pack))

    # (c) Keep the grid >= ~8 steps so double-buffering hides DMA and the row axis
    #     can shard across TensorCores; never below one packed sublane group.
    depth_cap = max(_round_up(pl.cdiv(rows, 8), pack), pack)
    tm = min(tm, depth_cap)

    if tm >= rows:
        return rows                       # single full-extent block (always legal)
    return max((tm // pack) * pack, pack)  # pack-aligned (divisible by 8 -> legal)


def layer_norm(x, g, b, eps=1e-5):
    """OpenAI-style LayerNorm over the last axis. x: (..., H); g, b: (H,)."""
    orig_shape = x.shape
    H = orig_shape[-1]
    rows = 1
    for d in orig_shape[:-1]:
        rows *= d

    # Lane-dense feature dim: pad H to a multiple of 128 so stores are full-width
    # vst (not masked vst.msk). The kernel corrects the reduction for the padding.
    H_pad = max(_round_up(H, 128), 128)
    n_pad = H_pad - H

    x2 = x.reshape(rows, H)
    g2 = g.reshape(1, H).astype(jnp.float32)
    b2 = b.reshape(1, H).astype(jnp.float32)
    if n_pad:
        x2 = jnp.pad(x2, ((0, 0), (0, n_pad)))
        g2 = jnp.pad(g2, ((0, 0), (0, n_pad)))
        b2 = jnp.pad(b2, ((0, 0), (0, n_pad)))

    itemsize = x.dtype.itemsize

    # Per-TensorCore VMEM capacity (v7x: 64 MiB/TC; v5e/v6e: 128 MiB).
    try:
        vmem_bytes = int(pltpu.get_tpu_info().vmem_capacity_bytes)
        # If the query reports per-chip capacity on a multi-TensorCore part (v7x),
        # split it across cores before budgeting (each TC has its own VMEM).
        try:
            cores = int(getattr(jax.local_devices()[0], "num_cores", 1) or 1)
        except Exception:
            cores = 1
        if cores > 1:
            vmem_bytes //= cores
    except Exception:
        vmem_bytes = 64 * 1024 * 1024     # conservative per-TC fallback (v7x)

    tm = _pick_tile_rows(rows, H_pad, itemsize, vmem_bytes)
    grid = pl.cdiv(rows, tm)              # ragged final block: masked writeback

    # VMEM limit from the same footprint used for tile sizing (covers the f32
    # intermediates for bf16/int8 inputs) + g/b + slack; floor 32 MiB (overrides
    # v5e's 16 MiB scoped default), cap ~85% of per-core VMEM for Mosaic scratch.
    per_row = H_pad * (4 * itemsize + 8)
    vmem_limit = tm * per_row + 4 * H_pad * 4 + (2 << 20)
    vmem_limit = max(vmem_limit, 32 << 20)
    vmem_limit = min(vmem_limit, max(int(vmem_bytes * 0.85), 16 << 20))

    kernel = functools.partial(_layernorm_kernel, eps=eps, h_true=H, n_pad=n_pad)

    out = pl.pallas_call(
        kernel,
        out_shape=jax.ShapeDtypeStruct((rows, H_pad), x.dtype),
        grid_spec=pltpu.PrefetchScalarGridSpec(
            num_scalar_prefetch=0,
            grid=(grid,),
            in_specs=[
                pl.BlockSpec((tm, H_pad), lambda i: (i, 0)),
                pl.BlockSpec((1, H_pad), lambda i: (0, 0)),
                pl.BlockSpec((1, H_pad), lambda i: (0, 0)),
            ],
            out_specs=pl.BlockSpec((tm, H_pad), lambda i: (i, 0)),
        ),
        compiler_params=pltpu.CompilerParams(
            dimension_semantics=("parallel",),   # row axis shards across TCs (v7x)
            vmem_limit_bytes=int(vmem_limit),
        ),
    )(x2, g2, b2)

    if n_pad:
        out = out[:, :H]
    return out.reshape(orig_shape)


if __name__ == "__main__":
    key = jax.random.PRNGKey(0)
    # Small shapes consistent with the module (n_state = hidden width).
    batch, seq, n_state = 2, 8, 128
    x = jax.random.normal(key, (batch, seq, n_state), dtype=jnp.float32)

    # Deterministic parameter init matching nn.Parameter(torch.ones/zeros(n_state)).
    g = jnp.ones((n_state,), dtype=jnp.float32)
    b = jnp.zeros((n_state,), dtype=jnp.float32)

    out = layer_norm(x, g, b, eps=1e-5)
    out = jax.block_until_ready(out)

    # Reference check in plain JAX (matches the PyTorch forward exactly).
    u = jnp.mean(x, axis=-1, keepdims=True)
    s = jnp.mean((x - u) ** 2, axis=-1, keepdims=True)
    ref = g * ((x - u) / jnp.sqrt(s + 1e-5)) + b
    assert jnp.allclose(out, ref, atol=1e-5, rtol=1e-5), "mismatch vs reference"

    # Extra sanity check: non-128-multiple feature dim exercises the padded path.
    n2 = 96
    x3 = jax.random.normal(jax.random.PRNGKey(1), (4, 5, n2), dtype=jnp.float32)
    g3 = jnp.ones((n2,), dtype=jnp.float32)
    b3 = jnp.zeros((n2,), dtype=jnp.float32)
    out3 = jax.block_until_ready(layer_norm(x3, g3, b3, eps=1e-5))
    u3 = jnp.mean(x3, axis=-1, keepdims=True)
    s3 = jnp.mean((x3 - u3) ** 2, axis=-1, keepdims=True)
    ref3 = g3 * ((x3 - u3) / jnp.sqrt(s3 + 1e-5)) + b3
    assert jnp.allclose(out3, ref3, atol=1e-5, rtol=1e-5), "mismatch (padded H)"

    print("KERNEL_OK")
</pallas_src>

<mosaic_0001>
module attributes {stable_mosaic.version = 11 : i64} {
  func.func @_layernorm_kernel(%arg0: i32, %arg1: memref<8x128xf32, #tpu.memory_space<vmem>>, %arg2: memref<1x128xf32, #tpu.memory_space<vmem>>, %arg3: memref<1x128xf32, #tpu.memory_space<vmem>>, %arg4: memref<8x128xf32, #tpu.memory_space<vmem>>) attributes {dimension_semantics = [#tpu.dimension_semantics<parallel>], iteration_bounds = array<i64: 2>, scalar_prefetch = 0 : i64, scratch_operands = 0 : i64, tpu.core_type = #tpu.core_type<tc>, window_params = [{transform_indices = @transform_0, window_bounds = array<i64: 8, 128>}, {pipeline_mode = #tpu.pipeline_mode<synchronous>, transform_indices = @transform_1, window_bounds = array<i64: 1, 128>}, {pipeline_mode = #tpu.pipeline_mode<synchronous>, transform_indices = @transform_2, window_bounds = array<i64: 1, 128>}, {transform_indices = @transform_3, window_bounds = array<i64: 8, 128>}]} {
    %c0 = arith.constant 0 : index
    %c0_0 = arith.constant 0 : index
    %0 = vector.load %arg1[%c0, %c0_0] : memref<8x128xf32, #tpu.memory_space<vmem>>, vector<8x128xf32>
    %cst = arith.constant dense<0.000000e+00> : vector<8xf32>
    %1 = vector.multi_reduction <add>, %0, %cst [1] : vector<8x128xf32> to vector<8xf32>
    %2 = vector.shape_cast %1 : vector<8xf32> to vector<8x1xf32>
    %cst_1 = arith.constant 7.812500e-03 : f32
    %3 = vector.broadcast %cst_1 : f32 to vector<8x1xf32>
    %4 = arith.mulf %2, %3 : vector<8x1xf32>
    %5 = vector.broadcast %4 : vector<8x1xf32> to vector<8x128xf32>
    %6 = arith.subf %0, %5 : vector<8x128xf32>
    %7 = arith.mulf %6, %6 : vector<8x128xf32>
    %cst_2 = arith.constant dense<0.000000e+00> : vector<8xf32>
    %8 = vector.multi_reduction <add>, %7, %cst_2 [1] : vector<8x128xf32> to vector<8xf32>
    %9 = vector.shape_cast %8 : vector<8xf32> to vector<8x1xf32>
    %cst_3 = arith.constant 7.812500e-03 : f32
    %10 = vector.broadcast %cst_3 : f32 to vector<8x1xf32>
    %11 = arith.mulf %9, %10 : vector<8x1xf32>
    %cst_4 = arith.constant 9.99999974E-6 : f32
    %12 = vector.broadcast %cst_4 : f32 to vector<8x1xf32>
    %13 = arith.addf %11, %12 : vector<8x1xf32>
    %14 = math.rsqrt %13 : vector<8x1xf32>
    %c0_5 = arith.constant 0 : index
    %c0_6 = arith.constant 0 : index
    %15 = vector.load %arg2[%c0_5, %c0_6] : memref<1x128xf32, #tpu.memory_space<vmem>>, vector<1x128xf32>
    %16 = vector.broadcast %14 : vector<8x1xf32> to vector<8x128xf32>
    %17 = vector.broadcast %15 : vector<1x128xf32> to vector<8x128xf32>
    %18 = arith.mulf %16, %17 : vector<8x128xf32>
    %19 = arith.mulf %6, %18 : vector<8x128xf32>
    %c0_7 = arith.constant 0 : index
    %c0_8 = arith.constant 0 : index
    %20 = vector.load %arg3[%c0_7, %c0_8] : memref<1x128xf32, #tpu.memory_space<vmem>>, vector<1x128xf32>
    %21 = vector.broadcast %20 : vector<1x128xf32> to vector<8x128xf32>
    %22 = arith.addf %19, %21 : vector<8x128xf32>
    %c0_9 = arith.constant 0 : index
    %c0_10 = arith.constant 0 : index
    %23 = vector.load %arg4[%c0_9, %c0_10] : memref<8x128xf32, #tpu.memory_space<vmem>>, vector<8x128xf32>
    tpu.vector_store %arg4[%c0_9, %c0_10], %22 {strides = array<i32>} : memref<8x128xf32, #tpu.memory_space<vmem>>, vector<8x128xf32>,
    return
  }
  func.func @transform_0(%arg0: i32) -> (i32, i32) {
    %c0_i32 = arith.constant 0 : i32
    %c0_i32_0 = arith.constant 0 : i32
    return %arg0, %c0_i32 : i32, i32
  }
  func.func @transform_1(%arg0: i32) -> (i32, i32) {
    %c0_i32 = arith.constant 0 : i32
    %c0_i32_0 = arith.constant 0 : i32
    %c0_i32_1 = arith.constant 0 : i32
    return %c0_i32, %c0_i32_0 : i32, i32
  }
  func.func @transform_2(%arg0: i32) -> (i32, i32) {
    %c0_i32 = arith.constant 0 : i32
    %c0_i32_0 = arith.constant 0 : i32
    %c0_i32_1 = arith.constant 0 : i32
    return %c0_i32, %c0_i32_0 : i32, i32
  }
  func.func @transform_3(%arg0: i32) -> (i32, i32) {
    %c0_i32 = arith.constant 0 : i32
    %c0_i32_0 = arith.constant 0 : i32
    return %arg0, %c0_i32 : i32, i32
  }
}

</mosaic_0001>

<bundles_post_ra>
// kernel: tpu_custom_call.1
= control target key start
LH: loop header
LB: loop body
LE: loop exit
PB: predicated region body
PF: predicated region fallthrough
CT: control target
= control target key end

     0   :  { %8 = vsyncpa [#allocation3], 0  ;;  %s624_s0 = inlined_call_operand.hbm [shape: f32[16,128], index: 0, kind: input, shape index: {}]   ;;  %s625_s1 = inlined_call_operand.vmem [shape: f32[1,128], index: 1, kind: input, shape index: {}]   ;;  %s626_s2 = inlined_call_operand.vmem [shape: f32[1,128], index: 2, kind: input, shape index: {}]   ;;  %s627_s3 = inlined_call_operand.hbm [shape: f32[16,128], index: 3, kind: output, shape index: {}]  }
   0x1   :  { %10 = vsyncpa [#allocation3 + $0x1], 0 }
   0x2   :  { %11 = vsyncpa [#allocation4], 0 }
   0x3   :  { %13 = vsyncpa [#allocation4 + $0x1], 0  ;;  %s477_s12 = smov 0   ;;  %s479_s13 = smov 0  }
   0x4   :  { %s481_s14 = smov 0   ;;  %s483_s15 = smov 0  }
   0x5 LB: > { %s498_s16 = sadd.s32 4294967295, %s453_s15   ;;  %s299_s17 = sadd.s32 4294967294, %s453_s15   ;;  %s453_s15 = sphi %s483_s15, %s644_s15   ;;  %s449_s14 = sphi %s481_s14, %s643_s14   ;;  %s445_s13 = sphi %s479_s13, %s642_s13   ;;  %s441_s12 = sphi %s477_s12, %s641_s12  }
   0x6   : > { %s502_s18 = sadd.s32 1, %s453_s15   ;;  %s26_s19 = sadd.s32 1, %s449_s14 }
   0x7   : > { %s23_s20 = ssub.s32 %s453_s15, %s502_s18  ;;  %p33_p0 = scmp.ne.s32.totalorder %s449_s14, %s445_s13 }
   0x8   : > { %p24_p1 = scmp.eq.s32.totalorder %s23_s20, 0  ;;  %p34_p2 = scmp.eq.s32.totalorder %s453_s15, 0 }
   0x9   : > { %p39_p3 = scmp.ne.s32.totalorder %s445_s13, %s441_s12  ;;  %p40_p4 = scmp.eq.s32.totalorder %s498_s16, 0 }
   0xa   : > { %s514_s21 = scalar_select %p24_p1, %s449_s14, %s26_s19  }
   0xb   : > { %p516_p5 = por %p34_p2, %p33_p0  ;;  %p520_p6 = por %p40_p4, %p39_p3 }
   0xc   : > { %p105_p7 = scmp.eq.s32.totalorder %s498_s16, 1  ;;  %p111_p8 = scmp.eq.s32.totalorder %s299_s17, 1 }
   0xd   : > { %s631_s23 = scalar_select %p520_p6, 1, 0 }
   0xe   : > { %p325_p10 = scmp.lt.s32.totalorder %s453_s15, 2  ;;  %p527_p11 = por %p105_p7, %p33_p0 }
   0xf   : > { %p531_p12 = por %p111_p8, %p39_p3  ;;  %s137_s26 = sand.u32 1, %s449_s14  }
  0x10   : > { %s632_s24 = scalar_select %p527_p11, 1, 0 }
  0x11   : > { %s633_s25 = scalar_select %p531_p12, 1, 0 }
  0x12   : > { %s303_s27 = sshll.u32 %s453_s15, 7  ;;  %s302_s28 = sshll.u32 %s137_s26, 3 }
  0x13   : > { %s540_s4 = scalar_lea.hbm %s624_s0, %s303_s27  ;;  %s141_s5 = scalar_lea.vmem [#allocation2], %s302_s28 }
  0x14   : > { %s148_s6 = sshll.u32 %s141_s5, 4  ;;  %p544_p13 = pnand %p325_p10, %p516_p5  ;;  %s548_s6 = int_to_ptr.vmem [resolvable:$true] %s148_s6 }
  0x15   : > { %s138_s8 = scalar_lea.sflag [#allocation3], %s137_s26  ;;  %s361_s9 = scalar_lea.hbm %s540_s4, 128 }
  0x16   : > { %p362_p2 = scmp.ne.s32.totalorder %s540_s4, %s361_s9  ;;  %p363_p3 = pneg %p544_p13 }
  0x17   : > { %s366_s17 = scalar_lea.hbm %s624_s0, 256  ;;  %p367_p5 = scmp.lt.s32.totalorder %s540_s4, %s624_s0 }
  0x18   : > { %p364_p4 = pnand %p363_p3, %p362_p2  ;;  %p368_p8 = scmp.lt.s32.totalorder %s366_s17, %s361_s9 }
  0x1a   : > { %p365_p7 = pneg %p364_p4  ;;  %p369_p10 = por %p368_p8, %p367_p5 }
  0x1c   : > { %p370_p9 = pnand %p369_p10, %p365_p7 }
  0x1e   : > { %373 = shalt.err (!%p370_p9)
}
  0x1f   : > { %s374_s22 = scalar_lea.vmem %s548_s6, 128  ;;  %s455_s26 = smov [#allocation2]  }
  0x20   : > { %p375_p0 = scmp.ne.s32.totalorder %s548_s6, %s374_s22  ;;  %s379_s27 = sshll.u32 %s455_s26, 4  ;;  %s380_s27 = int_to_ptr.vmem [resolvable:$false] %s379_s27 }
  0x21   : > { %s381_s28 = scalar_lea.vmem %s380_s27, 256  ;;  %p382_p4 = scmp.lt.s32.totalorder %s548_s6, %s380_s27 }
  0x22   : > { %p377_p1 = pnand %p375_p0, %p363_p3  ;;  %p383_p12 = scmp.lt.s32.totalorder %s381_s28, %s374_s22 }
  0x24   : > { %p378_p2 = pneg %p377_p1  ;;  %p384_p11 = por %p383_p12, %p382_p4 }
  0x26   : > { %p385_p6 = pnand %p384_p11, %p378_p2 }
  0x28   : > { %388 = shalt.err (!%p385_p6)
}
  0x29   : > { %320 = dma.hbm_to_vmem [thread:$0]  (!%p544_p13), %s540_s4, 128, %s548_s6, %s138_s8  }
  0x2a   : > { %p635_p9 = scmp.lt.s32.totalorder %s453_s15, 3  ;;  %p636_p7 = scmp.ge.s32.totalorder %s453_s15, 1 }
  0x2c   : > { %p154_p0 = pnand %p636_p7, %p635_p9 }
  0x2d   : > { %s575_s29 = sand.u32 (!%p154_p0), 1, %s445_s13   ;;  %p637_p6 = scmp.ne.s32.totalorder (!%p154_p0), %s631_s23, 0 }
  0x2e   : > { %157 = sbr.rel (%p154_p0) target bundleno = 372 (0x174), region = 32  ;;  %s305_s30 = sshll.u32 (!%p154_p0), %s575_s29, 3 }
  0x2f   : > { %s160_s5 = scalar_lea.sflag (!%p154_p0), [#allocation3], %s575_s29  ;;  %s163_s9 = scalar_lea.vmem (!%p154_p0), [#allocation2], %s305_s30 }
  0x33   : > { %432 = dma.done.wait (%p637_p6), %s160_s5, 128  }
  0x34   : > { %434 = vsyncadd (%p637_p6), %s160_s5, 4294967168  ;;  %v186_v0 = vld [vmem:[%s163_s9] sm:$0xff]  ;;  %s310_s8 = sshll.u32 %s498_s16, 7  ;;  %s185_s10 = scalar_lea.vmem [#allocation5], %s305_s30 }
  0x35   : > { %187 = vadd.xlane.f32.xlu0 %v186_v0  ;;  %v307_v8 = vld [vmem:[%s625_s1] ss:$0 sm:$0xff]  ;;  %s229_s11 = sshll.u32 %s185_s10, 4  ;;  %s227_s20 = scalar_lea.hbm %s627_s3, %s310_s8  ;;  %s230_s11 = int_to_ptr.vmem [resolvable:$true] %s229_s11 }
  0x36   : > { %v308_v11 = vld [vmem:[%s626_s2] ss:$0 sm:$0xff]  ;;  %s216_s22 = scalar_lea.sflag [#allocation4], %s575_s29  ;;  %s389_s26 = scalar_lea.vmem %s230_s11, 128 }
  0x37   : > { %p390_p11 = scmp.ne.s32.totalorder %s230_s11, %s389_s26  ;;  %p638_p12 = scmp.ne.s32.totalorder %s632_s24, 0 }
  0x38   : > { %s456_s27 = smov [#allocation5]  }
  0x39   : > { %p391_p13 = pnand %p390_p11, %p638_p12  ;;  %s393_s28 = sshll.u32 %s456_s27, 4  ;;  %s394_s28 = int_to_ptr.vmem [resolvable:$false] %s393_s28 }
  0x3a   : > { %s395_s16 = scalar_lea.vmem %s394_s28, 256  ;;  %p396_p3 = scmp.lt.s32.totalorder %s230_s11, %s394_s28 }
  0x3b   : > { %p392_p1 = pneg %p391_p13  ;;  %p397_p5 = scmp.lt.s32.totalorder %s395_s16, %s389_s26 }
  0x3d   : > { %p398_p8 = por %p397_p5, %p396_p3 }
  0x3f   : > { %p399_p10 = pnand %p398_p8, %p392_p1 }
  0xbe   : > { %v188_v1 = vpop.xlane.xlu0 %187 }
  0xbf   : > { %v189_v2 = vmul.f32 0.0078125, %v188_v1 }
  0xc1   : > { %v190_v3 = vsub.f32 %v186_v0, %v189_v2 }
  0xc3   : > { %v191_v4 = vmul.f32 %v190_v3, %v190_v3 }
  0xc5   : > { %192 = vadd.xlane.f32.xlu0 %v191_v4 }
 0x14e   : > { %v193_v5 = vpop.xlane.xlu0 %192 }
 0x14f   : > { %v194_v6 = vmul.f32 0.0078125, %v193_v5 }
 0x151   : > { %v195_v7 = vadd.f32 1e-05, %v194_v6 }
 0x153   : > { %359 = vrsqrt.f32 %v195_v7 }
 0x160   : > { %v360_v9 = vpop.eup %359 }
 0x161   : > { %v204_v10 = vmul.f32 %v360_v9, %v307_v8 }
 0x163   : > { %v205_v12 = vmul.f32 %v204_v10, %v190_v3 }
 0x165   : > { %v213_v13 = vadd.f32 %v308_v11, %v205_v12 }
 0x167   : > { %214 = vst [vmem:[%s185_s10] sm:$0xff] %v213_v13 }
 0x168   : > { %402 = shalt.err (!%p399_p10)
}
 0x169   : > { %s403_s30 = scalar_lea.hbm %s227_s20, 128  ;;  %s407_s9 = scalar_lea.hbm %s627_s3, 256 }
 0x16a   : > { %p404_p2 = scmp.ne.s32.totalorder %s227_s20, %s403_s30  ;;  %p408_p7 = scmp.lt.s32.totalorder %s227_s20, %s627_s3 }
 0x16b   : > { %p409_p0 = scmp.lt.s32.totalorder %s407_s9, %s403_s30 }
 0x16c   : > { %p405_p4 = pnand %p404_p2, %p638_p12 }
 0x16d   : > { %p410_p6 = por %p409_p0, %p408_p7 }
 0x16e   : > { %p406_p9 = pneg %p405_p4 }
 0x170   : > { %p411_p11 = pnand %p410_p6, %p406_p9 }
 0x172   : > { %414 = shalt.err (!%p411_p11)
}
 0x173   : > { %315 = dma.vmem_to_hbm [thread:$0]  (%p638_p12), %s230_s11, 128, %s227_s20, %s216_s22  }
 0x174 PF: > { %s241_s23 = sand.u32 1, %s441_s12   ;;  %p639_p13 = scmp.ne.s32.totalorder %s633_s25, 0 }
 0x175   : > { %p640_p1 = scmp.ge.s32.totalorder %s453_s15, 2  ;;  %s242_s7 = scalar_lea.sflag [#allocation4], %s241_s23 }
 0x177   : > { %p322_p3 = pnand %p640_p1, %p639_p13 }
 0x179   : > { %p323_p5 = pneg %p322_p3 }
 0x17b   : > { %436 = dma.done.wait (%p323_p5), %s242_s7, 128  }
 0x17c   : > { %438 = vsyncadd (%p323_p5), %s242_s7, 4294967168  ;;  %p16_p8 = scmp.ge.s32.totalorder %s502_s18, 4   ;;  %s641_s12 = smov %s445_s13 }
 0x17d   : > { %s642_s13 = smov %s449_s14  ;;  %s643_s14 = smov %s514_s21 }
 0x17e   : > { %s644_s15 = smov %s502_s18  ;;  %18 = sbr.rel (!%p16_p8) target bundleno = 5 (0x5), region = 77 }
 0x183   :  { %247 = vsyncpa [#allocation3], 1 }
 0x184   :  { %249 = vsyncpa [#allocation3 + $0x1], 1 }
 0x185   :  { %250 = vsyncpa [#allocation4], 1 }
 0x186   :  { %252 = vsyncpa [#allocation4 + $0x1], 1 }

</bundles_post_ra>
